<compile_context>
chip_gen: v7x
topology: tpu7x:2x2x1
jax: 0.10.0
libtpu: 0.0.40
codegen_flags: <defaults>
</compile_context>

<pallas_src>
import jax
import jax.numpy as jnp
from jax.experimental import pallas as pl
from jax.experimental.pallas import tpu as pltpu


def _round_up(x: int, m: int) -> int:
    return pl.cdiv(x, m) * m


def _pick_feature_tile(d_pad: int) -> int:
    """K tile: single tile up to 4096; else largest 128-multiple divisor <= 4096."""
    if d_pad <= 4096:
        return d_pad
    md = d_pad // 128
    best = 128
    for d in range(1, md + 1):
        if md % d == 0 and 128 * d <= 4096:
            best = max(best, 128 * d)
    # Pathological factorization: accept a small masked over-read on the last tile.
    return best if best >= 1024 else 2048


def _pick_batch_tile(b_pad: int, tk: int, budget_bytes: int = 32 * 1024 * 1024) -> int:
    """Largest 128-multiple dividing b_pad s.t. the double-buffered x block fits the
    budget, capped at 1024, preferring >= 2 (even-count) tiles for v7x megacore."""
    cap = max(128, (budget_bytes // (2 * tk * 4)) // 128 * 128)
    cap = min(cap, 1024)
    m = b_pad // 128
    cands = [128 * d for d in range(1, m + 1) if m % d == 0 and 128 * d <= cap]
    if not cands:
        cands = [128]
    if b_pad >= 256:
        multi = [t for t in cands if b_pad // t >= 2]
        if multi:
            cands = multi
    even = [t for t in cands if (b_pad // t) % 2 == 0]
    return max(even) if even else max(cands)


def _make_linear_kernel(d_valid: int, tk: int, num_k: int, group: int = 4):
    """GEMV kernel: (tb, tk) x tile * (1, tk) weight row -> (1, tb) output row."""
    n_chunks = tk // 128
    last_tile_base = (num_k - 1) * tk  # column offset of the last K tile

    def kernel(x_ref, w_ref, b_ref, o_ref, acc_ref):
        # x_ref: (tb, tk) VMEM    w_ref: (1, tk) VMEM    b_ref: (1, 1) SMEM
        # o_ref: (1, tb) VMEM     acc_ref: (tb, 128) VMEM (per-lane partials)
        k = pl.program_id(1)

        @pl.when(k == 0)
        def _init():
            acc_ref[...] = jnp.zeros_like(acc_ref)

        def chunk_term(j):
            xj = x_ref[:, j * 128:(j + 1) * 128].astype(jnp.float32)
            wj = w_ref[:, j * 128:(j + 1) * 128].astype(jnp.float32)
            # Static predicate: can chunk j of the *last* K tile reach past
            # d_valid?  For earlier K tiles the same select is a no-op (all
            # columns < d_valid), so no runtime branch is needed.  Mask x, not
            # w: OOB x garbage could be Inf/NaN and 0*Inf would poison rows.
            if last_tile_base + (j + 1) * 128 > d_valid:
                lane = jax.lax.broadcasted_iota(jnp.int32, (1, 128), 1)
                col = k * tk + j * 128 + lane
                xj = jnp.where(col < d_valid, xj, 0.0)
            return xj * wj

        # VPU-only accumulate of per-lane partial products into the slim
        # (tb, 128) scratch; chunks are grouped so the accumulator RMW happens
        # once per `group` chunks instead of once per chunk.
        for g in range(0, n_chunks, group):
            partial = chunk_term(g)
            for j in range(g + 1, min(g + group, n_chunks)):
                partial = partial + chunk_term(j)
            acc_ref[...] += partial

        @pl.when(k == num_k - 1)
        def _finalize():
            # One small cross-lane reduce per batch tile, add bias, store lane-dense.
            row = jnp.sum(acc_ref[...], axis=-1) + b_ref[0, 0]   # (tb,)
            o_ref[...] = row[None, :].astype(o_ref.dtype)        # (1, tb)

    return kernel


def logistic_regression_forward(x, w, b, *, tb=None, tk=None, force_pallas=False):
    """x: (B, D), w: (1, D) (PyTorch nn.Linear weight layout), b: (1,)
    -> (B, 1) equal to x @ w.T + b (the reference forward has no sigmoid)."""
    B, D = x.shape
    assert w.shape == (1, D) and b.shape == (1,)

    # Tiny problems: pad/launch/slice overhead dwarfs ~2*B*D FLOPs.
    if not force_pallas and B * D <= (1 << 20):
        y = x.astype(jnp.float32) @ w.T.astype(jnp.float32) + b.astype(jnp.float32)[None, :]
        return y.astype(x.dtype)

    D_pad = _round_up(D, 128)
    B_pad = _round_up(B, 128)

    # ---- feature (K) tile ----
    if tk is None:
        tk = _pick_feature_tile(D_pad)
    tk = max(128, _round_up(tk, 128))
    K_cover = _round_up(D, tk)          # == D_pad whenever tk divides D_pad
    num_k = K_cover // tk

    # ---- batch tile ----
    if tb is None:
        tb = _pick_batch_tile(B_pad, tk)
    tb = max(128, _round_up(tb, 128))
    B_cover = _round_up(B, tb)
    num_b = B_cover // tb

    # Only the (tiny) weight ever gets host-side padding; x streams unpadded.
    w_p = jnp.pad(w, ((0, 0), (0, K_cover - D))) if K_cover > D else w
    b2 = b.reshape(1, 1)

    kernel = _make_linear_kernel(D, tk, num_k)

    out_row = pl.pallas_call(
        kernel,
        out_shape=jax.ShapeDtypeStruct((1, B_cover), x.dtype),
        grid_spec=pltpu.PrefetchScalarGridSpec(
            num_scalar_prefetch=0,
            grid=(num_b, num_k),
            in_specs=[
                pl.BlockSpec((tb, tk), lambda i, k: (i, k)),         # x tile (OOB tail OK)
                pl.BlockSpec((1, tk), lambda i, k: (0, k)),          # weight row
                pl.BlockSpec(memory_space=pltpu.MemorySpace.SMEM),   # bias scalar
            ],
            out_specs=pl.BlockSpec((1, tb), lambda i, k: (0, i)),    # lane-dense output row
            scratch_shapes=[pltpu.VMEM((tb, 128), jnp.float32)],     # slim accumulator
        ),
        compiler_params=pltpu.CompilerParams(
            dimension_semantics=("parallel", "arbitrary"),
            vmem_limit_bytes=48 * 1024 * 1024,
        ),
    )(x, w_p, b2)

    return out_row[0, :B].reshape(B, 1)


if __name__ == "__main__":
    # Small shapes consistent with the module: batch=8, input_dim=32.
    B, D = 8, 32
    key = jax.random.PRNGKey(0)
    kx, kw, kb = jax.random.split(key, 3)

    x = jax.random.normal(kx, (B, D), dtype=jnp.float32)

    # nn.Linear default init U(-1/sqrt(D), 1/sqrt(D)); weight layout (out=1, in=D).
    bound = 1.0 / float(D) ** 0.5
    w = jax.random.uniform(kw, (1, D), dtype=jnp.float32, minval=-bound, maxval=bound)
    b = jax.random.uniform(kb, (1,), dtype=jnp.float32, minval=-bound, maxval=bound)

    y_ref = x @ w.T + b[None, :]

    # Pallas path (forced, so the kernel itself is exercised at the module's size).
    y = logistic_regression_forward(x, w, b, force_pallas=True)
    y = jax.block_until_ready(y)
    assert y.shape == (B, 1)
    assert jnp.allclose(y, y_ref, atol=1e-5, rtol=1e-5)

    # Small-shape fast path (no Pallas) must agree too.
    y_fast = jax.block_until_ready(logistic_regression_forward(x, w, b))
    assert jnp.allclose(y_fast, y_ref, atol=1e-5, rtol=1e-5)

    # Unaligned shapes: exercise the no-pad batch remainder and the in-kernel
    # feature-tail mask, on both the auto-tiled and the forced multi-K-tile paths.
    B2, D2 = 1000, 300
    x2 = jax.random.normal(kx, (B2, D2), dtype=jnp.float32)
    w2 = jax.random.uniform(kw, (1, D2), dtype=jnp.float32, minval=-bound, maxval=bound)
    y2_ref = x2 @ w2.T + b[None, :]

    y2 = logistic_regression_forward(x2, w2, b, force_pallas=True)
    y2 = jax.block_until_ready(y2)
    assert y2.shape == (B2, 1)
    assert jnp.allclose(y2, y2_ref, atol=1e-4, rtol=1e-4)

    y3 = logistic_regression_forward(x2, w2, b, tb=128, tk=128, force_pallas=True)
    y3 = jax.block_until_ready(y3)
    assert jnp.allclose(y3, y2_ref, atol=1e-4, rtol=1e-4)

    print("KERNEL_OK")
</pallas_src>

<mosaic_0001>
module attributes {stable_mosaic.version = 11 : i64} {
  func.func @kernel(%arg0: i32, %arg1: i32, %arg2: memref<128x128xf32, #tpu.memory_space<vmem>>, %arg3: memref<1x128xf32, #tpu.memory_space<vmem>>, %arg4: memref<1x1xf32, #tpu.memory_space<smem>>, %arg5: memref<1x128xf32, #tpu.memory_space<vmem>>, %arg6: memref<128x128xf32, #tpu.memory_space<vmem>>) attributes {dimension_semantics = [#tpu.dimension_semantics<parallel>, #tpu.dimension_semantics<arbitrary>], iteration_bounds = array<i64: 1, 1>, scalar_prefetch = 0 : i64, scratch_operands = 1 : i64, tpu.core_type = #tpu.core_type<tc>, window_params = [{transform_indices = @transform_0, window_bounds = array<i64: 128, 128>}, {transform_indices = @transform_1, window_bounds = array<i64: 1, 128>}, {transform_indices = @transform_2, window_bounds = array<i64: 1, 1>}, {transform_indices = @transform_3, window_bounds = array<i64: 1, 128>}]} {
    %c0_i32 = arith.constant 0 : i32
    %0 = arith.cmpi eq, %arg1, %c0_i32 : i32
    %1 = arith.extui %0 : i1 to i32
    %c0_i32_0 = arith.constant 0 : i32
    %2 = arith.cmpi ne, %1, %c0_i32_0 : i32
    scf.if %2 {
      %cst_11 = arith.constant 0.000000e+00 : f32
      %24 = vector.broadcast %cst_11 : f32 to vector<128x128xf32>
      %c0_12 = arith.constant 0 : index
      %c0_13 = arith.constant 0 : index
      %25 = vector.load %arg6[%c0_12, %c0_13] : memref<128x128xf32, #tpu.memory_space<vmem>>, vector<128x128xf32>
      tpu.vector_store %arg6[%c0_12, %c0_13], %24 {strides = array<i32>} : memref<128x128xf32, #tpu.memory_space<vmem>>, vector<128x128xf32>,
    } else {
    }
    %c0 = arith.constant 0 : index
    %c0_1 = arith.constant 0 : index
    %3 = vector.load %arg2[%c0, %c0_1] : memref<128x128xf32, #tpu.memory_space<vmem>>, vector<128x128xf32>
    %c0_2 = arith.constant 0 : index
    %c0_3 = arith.constant 0 : index
    %4 = vector.load %arg3[%c0_2, %c0_3] : memref<1x128xf32, #tpu.memory_space<vmem>>, vector<1x128xf32>
    %5 = tpu.iota {dimensions = array<i32: 1>} : vector<1x128xi32>
    %c128_i32 = arith.constant 128 : i32
    %6 = arith.muli %arg1, %c128_i32 : i32
    %c0_i32_4 = arith.constant 0 : i32
    %7 = arith.addi %6, %c0_i32_4 : i32
    %8 = vector.broadcast %7 : i32 to vector<1x128xi32>
    %9 = arith.addi %8, %5 : vector<1x128xi32>
    %c32_i32 = arith.constant 32 : i32
    %10 = vector.broadcast %c32_i32 : i32 to vector<1x128xi32>
    %11 = arith.cmpi slt, %9, %10 : vector<1x128xi32>
    %cst = arith.constant 0.000000e+00 : f32
    %12 = vector.shape_cast %11 : vector<1x128xi1> to vector<1x128xi1>
    %13 = vector.broadcast %12 : vector<1x128xi1> to vector<128x128xi1>
    %14 = vector.broadcast %cst : f32 to vector<128x128xf32>
    %15 = arith.select %13, %3, %14 : vector<128x128xi1>, vector<128x128xf32>
    %16 = vector.broadcast %4 : vector<1x128xf32> to vector<128x128xf32>
    %17 = arith.mulf %15, %16 : vector<128x128xf32>
    %c0_5 = arith.constant 0 : index
    %c0_6 = arith.constant 0 : index
    %18 = vector.load %arg6[%c0_5, %c0_6] : memref<128x128xf32, #tpu.memory_space<vmem>>, vector<128x128xf32>
    %19 = arith.addf %18, %17 : vector<128x128xf32>
    %c0_7 = arith.constant 0 : index
    %c0_8 = arith.constant 0 : index
    %20 = vector.load %arg6[%c0_7, %c0_8] : memref<128x128xf32, #tpu.memory_space<vmem>>, vector<128x128xf32>
    tpu.vector_store %arg6[%c0_7, %c0_8], %19 {strides = array<i32>} : memref<128x128xf32, #tpu.memory_space<vmem>>, vector<128x128xf32>,
    %c0_i32_9 = arith.constant 0 : i32
    %21 = arith.cmpi eq, %arg1, %c0_i32_9 : i32
    %22 = arith.extui %21 : i1 to i32
    %c0_i32_10 = arith.constant 0 : i32
    %23 = arith.cmpi ne, %22, %c0_i32_10 : i32
    scf.if %23 {
      %c0_11 = arith.constant 0 : index
      %c0_12 = arith.constant 0 : index
      %24 = vector.load %arg6[%c0_11, %c0_12] : memref<128x128xf32, #tpu.memory_space<vmem>>, vector<128x128xf32>
      %cst_13 = arith.constant dense<0.000000e+00> : vector<128xf32>
      %25 = vector.multi_reduction <add>, %24, %cst_13 [1] : vector<128x128xf32> to vector<128xf32>
      %c0_14 = arith.constant 0 : index
      %c0_15 = arith.constant 0 : index
      %26 = memref.load %arg4[%c0_14, %c0_15] : memref<1x1xf32, #tpu.memory_space<smem>>
      %27 = vector.broadcast %26 : f32 to vector<128xf32>
      %28 = arith.addf %25, %27 : vector<128xf32>
      %29 = vector.shape_cast %28 : vector<128xf32> to vector<1x128xf32>
      %c0_16 = arith.constant 0 : index
      %c0_17 = arith.constant 0 : index
      %30 = vector.load %arg5[%c0_16, %c0_17] : memref<1x128xf32, #tpu.memory_space<vmem>>, vector<1x128xf32>
      tpu.vector_store %arg5[%c0_16, %c0_17], %29 {strides = array<i32>} : memref<1x128xf32, #tpu.memory_space<vmem>>, vector<1x128xf32>,
    } else {
    }
    return
  }
  func.func @transform_0(%arg0: i32, %arg1: i32) -> (i32, i32) {
    %c0_i32 = arith.constant 0 : i32
    return %arg0, %arg1 : i32, i32
  }
  func.func @transform_1(%arg0: i32, %arg1: i32) -> (i32, i32) {
    %c0_i32 = arith.constant 0 : i32
    %c0_i32_0 = arith.constant 0 : i32
    return %c0_i32, %arg1 : i32, i32
  }
  func.func @transform_2(%arg0: i32, %arg1: i32) -> (i32, i32) {
    %c0_i32 = arith.constant 0 : i32
    %c0_i32_0 = arith.constant 0 : i32
    %c0_i32_1 = arith.constant 0 : i32
    return %c0_i32, %c0_i32_0 : i32, i32
  }
  func.func @transform_3(%arg0: i32, %arg1: i32) -> (i32, i32) {
    %c0_i32 = arith.constant 0 : i32
    %c0_i32_0 = arith.constant 0 : i32
    return %c0_i32, %arg0 : i32, i32
  }
}

</mosaic_0001>

<bundles_post_ra>
// kernel: tpu_custom_call.1
= control target key start
LH: loop header
LB: loop body
LE: loop exit
PB: predicated region body
PF: predicated region fallthrough
CT: control target
= control target key end

     0   :  { %9 = vsyncpa [#allocation5], 0  ;;  %s629_s0 = inlined_call_operand.hbm [shape: f32[8,32], index: 0, kind: input, shape index: {}]   ;;  %s630_s1 = inlined_call_operand.vmem [shape: f32[1,128], index: 1, kind: input, shape index: {}]   ;;  %s631_s2 = inlined_call_operand.<no memory space> [shape: f32[1,1], index: 2, kind: input, shape index: {}]   ;;  %s632_s3 = inlined_call_operand.hbm [shape: f32[1,128], index: 3, kind: output, shape index: {}]  }
   0x1   :  { %10 = vsyncpa [#allocation6], 0 }
   0x2   :  { %15 = vsyncadd [#allocation5], 1920  ;;  %s425_s12 = smov [#allocation4]   ;;  %s377_s16 = scalar_lea.hbm %s629_s0, 128 }
   0x3   :  { %s16_s13 = sshll.u32 %s425_s12, 4  ;;  %p378_p0 = scmp.ne.s32.totalorder %s629_s0, %s377_s16  ;;  %s17_s13 = int_to_ptr.vmem [resolvable:$true] %s16_s13 }
   0x4   :  { %p381_p1 = scmp.lt.u32.totalorder %s377_s16, %s629_s0 }
   0x6   :  { %p383_p2 = pnand %p381_p1, %p378_p0 }
   0x8   :  { %386 = shalt.err (!%p383_p2)
}
   0x9   :  { %s387_s21 = scalar_lea.vmem %s17_s13, 128  ;;  %s391_s22 = scalar_lea.vmem %s17_s13, 2048 }
   0xa   :  { %p388_p3 = scmp.ne.s32.totalorder %s17_s13, %s387_s21  ;;  %p392_p4 = scmp.lt.s32.totalorder %s17_s13, %s17_s13 }
   0xb   :  { %p393_p5 = scmp.lt.s32.totalorder %s391_s22, %s387_s21 }
   0xd   :  { %p394_p6 = por %p393_p5, %p392_p4 }
   0xf   :  { %p395_p7 = pnand %p394_p6, %p388_p3 }
  0x11   :  { %398 = shalt.err (!%p395_p7)
}
  0x12   :  { %s426_s23 = smov 128   ;;  %s427_s24 = smov 8  }
  0x13   :  { %22 = dma.hbm_to_vmem [thread:$0]  %s629_s0, 128, %s17_s13, [#allocation5], %s426_s23, %s426_s23, %s427_s24  }
  0x14   :  { %421 = dma.done.wait [#allocation5], 2048  }
  0x15   :  { %422 = vsyncadd [#allocation5], 4294965248  ;;  %v67_v0 = vlaneseq  ;;  %v50_v4 = vld [vmem:[#allocation4] sm:$0xff]  ;;  %v52_v6 = vld [vmem:[#allocation4 + $0x10] sm:$0xff]  ;;  %vm255_vm1 = vcmask 130112   ;;  %vm262_vm2 = vcmask 195712  }
  0x16   :  { %v471_v5 = vld [vmem:[%s630_s1] ss:$0 sm:$0xff]  ;;  %v51_v9 = vld [vmem:[#allocation4 + $0x8] sm:$0xff]  ;;  %v53_v10 = vld [vmem:[#allocation4 + $0x18] sm:$0xff]  ;;  %vm269_vm3 = vcmask 261312   ;;  %vm276_vm4 = vcmask 326912  }
  0x17   :  { %v461_v1 = vand.u32 127, %v67_v0  ;;  %v463_v2 = vshrl.u32 %v67_v0, 7  ;;  %v54_v15 = vld [vmem:[#allocation4 + $0x20] sm:$0xff]  ;;  %v55_v16 = vld [vmem:[#allocation4 + $0x28] sm:$0xff]  ;;  %v56_v21 = vld [vmem:[#allocation4 + $0x30] sm:$0xff]  ;;  %vm283_vm5 = vcmask 392512  }
  0x18   :  { %v57_v22 = vld [vmem:[#allocation4 + $0x38] sm:$0xff]  ;;  %v58_v27 = vld [vmem:[#allocation4 + $0x40] sm:$0xff]  ;;  %v59_v28 = vld [vmem:[#allocation4 + $0x48] sm:$0xff]  ;;  %vm290_vm6 = vcmask 458112   ;;  %vm297_vm7 = vcmask 523712   ;;  %vm304_vm8 = vcmask 589312  }
  0x19   :  { %v248_v3 = vsub.s32 %v461_v1, %v463_v2  ;;  %vm72_vm0 = vcmp.lt.s32.totalorder %v461_v1, 32  ;;  %v60_v33 = vld [vmem:[#allocation4 + $0x50] sm:$0xff]  ;;  %v61_v34 = vld [vmem:[#allocation4 + $0x58] sm:$0xff]  ;;  %v508_v39 = vadd.s32 4294967280, %v461_v1  ;;  %v62_v40 = vld [vmem:[#allocation4 + $0x60] sm:$0xff]  ;;  %v250_v45 = vadd.s32 4294967288, %v461_v1 }
  0x1a   :  { %v75_v7 = vsel %vm72_vm0, %v50_v4, 0.0  ;;  %v77_v8 = vsel %vm72_vm0, %v52_v6, 0.0  ;;  %v76_v13 = vsel %vm72_vm0, %v51_v9, 0.0  ;;  %v78_v14 = vsel %vm72_vm0, %v53_v10, 0.0  ;;  %v63_v41 = vld [vmem:[#allocation4 + $0x68] sm:$0xff]  ;;  %v64_v49 = vld [vmem:[#allocation4 + $0x70] sm:$0xff] }
  0x1b   :  { %v97_v11 = vmul.f32 %v471_v5, %v75_v7  ;;  %v99_v12 = vmul.f32 %v471_v5, %v77_v8  ;;  %v98_v17 = vmul.f32 %v471_v5, %v76_v13  ;;  %v100_v18 = vmul.f32 %v471_v5, %v78_v14  ;;  %v65_v50 = vld [vmem:[#allocation4 + $0x78] sm:$0xff] }
  0x1c   :  { %v79_v19 = vsel %vm72_vm0, %v54_v15, 0.0  ;;  %v80_v20 = vsel %vm72_vm0, %v55_v16, 0.0  ;;  %v81_v25 = vsel %vm72_vm0, %v56_v21, 0.0  ;;  %v82_v26 = vsel %vm72_vm0, %v57_v22, 0.0 }
  0x1d   :  { %180 = vadd.xlane.f32.xlu0 %v97_v11  ;;  %184 = vadd.xlane.f32.xlu1 %v99_v12  ;;  %v101_v23 = vmul.f32 %v471_v5, %v79_v19  ;;  %v102_v24 = vmul.f32 %v471_v5, %v80_v20  ;;  %v103_v29 = vmul.f32 %v471_v5, %v81_v25  ;;  %v83_v31 = vsel %vm72_vm0, %v58_v27, 0.0 }
  0x1e   :  { %v104_v30 = vmul.f32 %v471_v5, %v82_v26  ;;  %v84_v32 = vsel %vm72_vm0, %v59_v28, 0.0  ;;  %v105_v35 = vmul.f32 %v471_v5, %v83_v31  ;;  %v85_v37 = vsel %vm72_vm0, %v60_v33, 0.0 }
  0x1f   :  { %v106_v36 = vmul.f32 %v471_v5, %v84_v32  ;;  %v86_v38 = vsel %vm72_vm0, %v61_v34, 0.0  ;;  %v260_v42 = vsub.s32 %v508_v39, %v463_v2  ;;  %v107_v43 = vmul.f32 %v471_v5, %v85_v37 }
  0x20   :  { %v108_v44 = vmul.f32 %v471_v5, %v86_v38  ;;  %v87_v46 = vsel %vm72_vm0, %v62_v40, 0.0  ;;  %v88_v47 = vsel %vm72_vm0, %v63_v41, 0.0  ;;  %v264_v48 = vadd.s32 4294967272, %v461_v1 }
  0x21   :  { %182 = vadd.xlane.f32.xlu0 %v98_v17  ;;  %186 = vadd.xlane.f32.xlu1 %v100_v18  ;;  %v253_v51 = vsub.s32 %v250_v45, %v463_v2  ;;  %v109_v53 = vmul.f32 %v471_v5, %v87_v46  ;;  %v110_v54 = vmul.f32 %v471_v5, %v88_v47  ;;  %v271_v55 = vadd.s32 4294967264, %v461_v1 }
  0x22   :  { %v267_v52 = vsub.s32 %v264_v48, %v463_v2  ;;  %v89_v56 = vsel %vm72_vm0, %v64_v49, 0.0  ;;  %v90_v57 = vsel %vm72_vm0, %v65_v50, 0.0  ;;  %v278_v58 = vadd.s32 4294967256, %v461_v1 }
  0x23   :  { %v274_v59 = vsub.s32 %v271_v55, %v463_v2  ;;  %v111_v61 = vmul.f32 %v471_v5, %v89_v56  ;;  %v112_v62 = vmul.f32 %v471_v5, %v90_v57  ;;  %v285_v63 = vadd.s32 4294967248, %v461_v1 }
  0x24   :  { %v281_v60 = vsub.s32 %v278_v58, %v463_v2  ;;  %v292_v0 = vadd.s32 4294967240, %v461_v1  ;;  %v299_v7 = vadd.s32 4294967232, %v461_v1  ;;  %v306_v8 = vadd.s32 4294967224, %v461_v1 }
  0x25   :  { %188 = vadd.xlane.f32.xlu0 %v101_v23  ;;  %190 = vadd.xlane.f32.xlu1 %v102_v24  ;;  %v288_v4 = vsub.s32 %v285_v63, %v463_v2  ;;  %v543_v5 = vadd.s32 4294967216, %v461_v1  ;;  %v546_v11 = vadd.s32 4294967208, %v461_v1  ;;  %v553_v14 = vadd.s32 4294967200, %v461_v1 }
  0x26   :  { %v295_v6 = vsub.s32 %v292_v0, %v463_v2  ;;  %v302_v9 = vsub.s32 %v299_v7, %v463_v2  ;;  %v309_v10 = vsub.s32 %v306_v8, %v463_v2  ;;  %v556_v15 = vadd.s32 4294967192, %v461_v1 }
  0x27   :  { %v316_v12 = vsub.s32 %v543_v5, %v463_v2  ;;  %v323_v13 = vsub.s32 %v546_v11, %v463_v2  ;;  %v330_v16 = vsub.s32 %v553_v14, %v463_v2  ;;  %v563_v18 = vadd.s32 4294967184, %v461_v1 }
  0x28   :  { %v337_v17 = vsub.s32 %v556_v15, %v463_v2  ;;  %v566_v19 = vadd.s32 4294967176, %v461_v1  ;;  %v575_v22 = vstv %s631_s2  ;;  %vm311_vm9 = vcmask 654912   ;;  %s428_s2 = smov [#allocation7]  }
  0x29   :  { %192 = vadd.xlane.f32.xlu0 %v103_v29  ;;  %194 = vadd.xlane.f32.xlu1 %v104_v30  ;;  %v344_v20 = vsub.s32 %v563_v18, %v463_v2  ;;  %vm318_vm10 = vcmask 720512   ;;  %vm325_vm11 = vcmask 786112   ;;  %vm332_vm12 = vcmask 851712   ;;  %s363_s29 = sshll.u32 %s428_s2, 4  ;;  %s364_s29 = int_to_ptr.vmem [resolvable:$true] %s363_s29 }
  0x2a   :  { %v351_v21 = vsub.s32 %v566_v19, %v463_v2  ;;  %vm339_vm13 = vcmask 917312   ;;  %vm346_vm14 = vcmask 982912   ;;  %vm353_vm15 = vcmask 1048512   ;;  %s399_s30 = scalar_lea.vmem %s364_s29, 16  ;;  %s403_s4 = scalar_lea.vmem %s364_s29, 32 }
  0x2b   :  { %p400_p8 = scmp.ne.s32.totalorder %s364_s29, %s399_s30  ;;  %p404_p9 = scmp.lt.s32.totalorder %s364_s29, %s364_s29 }
  0x2c   :  { %p405_p10 = scmp.lt.s32.totalorder %s403_s4, %s399_s30 }
  0x2d   :  { %196 = vadd.xlane.f32.xlu0 %v105_v35  ;;  %198 = vadd.xlane.f32.xlu1 %v106_v36 }
  0x2e   :  { %p406_p11 = por %p405_p10, %p404_p9 }
  0x30   :  { %p407_p12 = pnand %p406_p11, %p400_p8 }
  0x31   :  { %200 = vadd.xlane.f32.xlu0 %v107_v43  ;;  %202 = vadd.xlane.f32.xlu1 %v108_v44 }
  0x35   :  { %204 = vadd.xlane.f32.xlu0 %v109_v53  ;;  %206 = vadd.xlane.f32.xlu1 %v110_v54 }
  0x39   :  { %208 = vadd.xlane.f32.xlu0 %v111_v61  ;;  %210 = vadd.xlane.f32.xlu1 %v112_v62 }
  0xaa   :  { %v181_v23 = vpop.xlane.xlu0 %180  ;;  %v185_v24 = vpop.xlane.xlu1 %184 }
  0xab   :  { %v214_v25 = vadd.f32 %v575_v22, %v181_v23  ;;  %v216_v26 = vadd.f32 %v575_v22, %v185_v24 }
  0xad   :  { %v249_v31 = vrot.slane %v214_v25, %v248_v3  ;;  %v261_v34 = vrot.slane %v216_v26, %v260_v42 }
  0xae   :  { %v183_v27 = vpop.xlane.xlu0 %182  ;;  %v187_v28 = vpop.xlane.xlu1 %186 }
  0xaf   :  { %v215_v29 = vadd.f32 %v575_v22, %v183_v27  ;;  %v217_v30 = vadd.f32 %v575_v22, %v187_v28 }
  0xb1   :  { %v254_v32 = vrot.slane %v215_v29, %v253_v51  ;;  %v268_v33 = vrot.slane %v217_v30, %v267_v52 }
  0xb2   :  { %v189_v35 = vpop.xlane.xlu0 %188  ;;  %v191_v36 = vpop.xlane.xlu1 %190 }
  0xb3   :  { %v256_v37 = vsel %vm255_vm1, %v254_v32, %v249_v31  ;;  %v218_v38 = vadd.f32 %v575_v22, %v189_v35  ;;  %v219_v40 = vadd.f32 %v575_v22, %v191_v36 }
  0xb4   :  { %v263_v41 = vsel %vm262_vm2, %v261_v34, %v256_v37 }
  0xb5   :  { %v270_v43 = vsel %vm269_vm3, %v268_v33, %v263_v41  ;;  %v275_v1 = vrot.slane %v218_v38, %v274_v59  ;;  %v282_v3 = vrot.slane %v219_v40, %v281_v60 }
  0xb6   :  { %v193_v44 = vpop.xlane.xlu0 %192  ;;  %v195_v45 = vpop.xlane.xlu1 %194 }
  0xb7   :  { %v277_v46 = vsel %vm276_vm4, %v275_v1, %v270_v43  ;;  %v220_v39 = vadd.f32 %v575_v22, %v193_v44  ;;  %v221_v42 = vadd.f32 %v575_v22, %v195_v45 }
  0xb8   :  { %v284_v47 = vsel %vm283_vm5, %v282_v3, %v277_v46 }
  0xb9   :  { %v289_v48 = vrot.slane %v220_v39, %v288_v4  ;;  %v296_v49 = vrot.slane %v221_v42, %v295_v6 }
  0xba   :  { %v197_v50 = vpop.xlane.xlu0 %196  ;;  %v199_v51 = vpop.xlane.xlu1 %198 }
  0xbb   :  { %v291_v52 = vsel %vm290_vm6, %v289_v48, %v284_v47  ;;  %v222_v53 = vadd.f32 %v575_v22, %v197_v50  ;;  %v223_v54 = vadd.f32 %v575_v22, %v199_v51 }
  0xbc   :  { %v298_v55 = vsel %vm297_vm7, %v296_v49, %v291_v52 }
  0xbd   :  { %v303_v56 = vrot.slane %v222_v53, %v302_v9  ;;  %v310_v57 = vrot.slane %v223_v54, %v309_v10 }
  0xbe   :  { %v201_v58 = vpop.xlane.xlu0 %200  ;;  %v203_v59 = vpop.xlane.xlu1 %202 }
  0xbf   :  { %v305_v60 = vsel %vm304_vm8, %v303_v56, %v298_v55  ;;  %v224_v61 = vadd.f32 %v575_v22, %v201_v58  ;;  %v225_v62 = vadd.f32 %v575_v22, %v203_v59 }
  0xc0   :  { %v312_v63 = vsel %vm311_vm9, %v310_v57, %v305_v60 }
  0xc1   :  { %v317_v0 = vrot.slane %v224_v61, %v316_v12  ;;  %v324_v4 = vrot.slane %v225_v62, %v323_v13 }
  0xc2   :  { %v205_v6 = vpop.xlane.xlu0 %204  ;;  %v207_v7 = vpop.xlane.xlu1 %206 }
  0xc3   :  { %v319_v8 = vsel %vm318_vm10, %v317_v0, %v312_v63  ;;  %v226_v9 = vadd.f32 %v575_v22, %v205_v6  ;;  %v227_v10 = vadd.f32 %v575_v22, %v207_v7 }
  0xc4   :  { %v326_v23 = vsel %vm325_vm11, %v324_v4, %v319_v8 }
  0xc5   :  { %v331_v24 = vrot.slane %v226_v9, %v330_v16  ;;  %v338_v5 = vrot.slane %v227_v10, %v337_v17 }
  0xc6   :  { %v209_v11 = vpop.xlane.xlu0 %208  ;;  %v211_v12 = vpop.xlane.xlu1 %210 }
  0xc7   :  { %v333_v13 = vsel %vm332_vm12, %v331_v24, %v326_v23  ;;  %v228_v25 = vadd.f32 %v575_v22, %v209_v11  ;;  %v229_v26 = vadd.f32 %v575_v22, %v211_v12 }
  0xc8   :  { %v340_v27 = vsel %vm339_vm13, %v338_v5, %v333_v13 }
  0xc9   :  { %v345_v14 = vrot.slane %v228_v25, %v344_v20  ;;  %v352_v15 = vrot.slane %v229_v26, %v351_v21 }
  0xcb   :  { %v347_v16 = vsel %vm346_vm14, %v345_v14, %v340_v27 }
  0xcc   :  { %v354_v17 = vsel %vm353_vm15, %v352_v15, %v347_v16 }
  0xcd   :  { %356 = vst [vmem:[#allocation7] sm:$0x1] %v354_v17 }
  0xce   :  { %410 = shalt.err (!%p407_p12)
}
  0xcf   :  { %s411_s7 = scalar_lea.hbm %s632_s3, 16 }
  0xd0   :  { %p412_p13 = scmp.ne.s32.totalorder %s632_s3, %s411_s7  ;;  %p415_p0 = scmp.lt.u32.totalorder %s411_s7, %s632_s3 }
  0xd2   :  { %p417_p1 = pnand %p415_p0, %p412_p13 }
  0xd4   :  { %420 = shalt.err (!%p417_p1)
}
  0xd5   :  { %366 = dma.vmem_to_hbm [thread:$0]  %s364_s29, 16, %s632_s3, [#allocation6]  }
  0xd6   :  { %423 = dma.done.wait [#allocation6], 16  }
  0xd7   :  { %424 = vsyncadd [#allocation6], 4294967280 }
  0xd8   :  { %370 = vsyncpa [#allocation5], 1 }
  0xd9   :  { %371 = vsyncpa [#allocation6], 1 }

</bundles_post_ra>
